<compile_context>
chip_gen: v7x
topology: tpu7x:2x2x1
jax: 0.10.0
libtpu: 0.0.40
codegen_flags: <defaults>
</compile_context>

<pallas_src>
import functools

import jax
import jax.numpy as jnp
from jax import lax
from jax.experimental import pallas as pl
from jax.experimental.pallas import tpu as pltpu


# ----------------------------------------------------------------------------
# Fused LayerNorm + Linear (+ bias) Pallas kernel
# ----------------------------------------------------------------------------
def _ln_linear_kernel(x_ref, w_ref, bias_ref, o_ref, *, eps):
    # x_ref: (TM, E) native dtype, w: (E, Npad) bf16, bias: (1, Npad) f32.
    x = x_ref[...].astype(jnp.float32)
    mean = jnp.mean(x, axis=-1, keepdims=True)
    ex2 = jnp.mean(x * x, axis=-1, keepdims=True)     # independent reductions
    var = ex2 - mean * mean                           # biased var, matches torch
    xn = (x - mean) * lax.rsqrt(var + eps)            # LN affine folded into W
    acc = jnp.dot(xn.astype(jnp.bfloat16), w_ref[...],  # bf16 MXU, f32 acc
                  preferred_element_type=jnp.float32)
    o_ref[...] = (acc + bias_ref[...]).astype(o_ref.dtype)   # fused epilogue


def _tpu_defaults():
    """(tm_max, vmem_limit_bytes): bigger tiles on v5e/v6e, safe on v7x/unknown."""
    try:
        vmem = pltpu.get_tpu_info().vmem_capacity_bytes
    except Exception:
        vmem = None
    if vmem is not None and vmem > 64 * 1024 * 1024:      # v5e / v6e (128 MiB)
        return 512, 64 * 1024 * 1024
    return 256, 32 * 1024 * 1024                          # v7x (64 MiB) / unknown


def _pick_tm(m, tm_max, min_steps=8):
    """Row tile: prefer a divisor of M (no activation padding) that yields
    >= min_steps grid steps so each TensorCore gets a pipelined loop."""
    cands = [c for c in (1024, 512, 256, 128, 64, 32, 16, 8) if c <= tm_max]
    divs = [c for c in cands if m % c == 0]
    for c in divs:                      # largest divisor with enough steps
        if m // c >= min_steps:
            return c, False
    if divs:                            # tiny M: most steps among divisors
        return divs[-1], False
    for c in cands:                     # ragged M fallback: pad, keep steps
        if pl.cdiv(m, c) >= min_steps:
            return c, True
    return cands[-1], True


def fused_layernorm_linear(x2d, w_pad, bias_pad, *, eps=1e-5, out_dtype=None,
                           tm_max=None, vmem_limit_bytes=None):
    """LayerNorm(last dim) then x @ w_pad + bias_pad.

    x2d: (M, E) any float dtype. w_pad: (E, Npad) bf16, bias_pad: (1, Npad) f32
    — both pre-folded / pre-padded at init (Npad multiple of 128).
    """
    M, E = x2d.shape
    E2, n_pad = w_pad.shape
    assert E == E2 and n_pad % 128 == 0
    if out_dtype is None:
        out_dtype = x2d.dtype

    if tm_max is None or vmem_limit_bytes is None:
        d_tm, d_vmem = _tpu_defaults()
        tm_max = tm_max or d_tm
        vmem_limit_bytes = vmem_limit_bytes or d_vmem

    tm, need_pad = _pick_tm(M, tm_max)
    x_in, m_pad = x2d, M
    if need_pad:                       # rare fallback (ragged M only)
        m_pad = pl.cdiv(M, tm) * tm
        x_in = jnp.pad(x2d, ((0, m_pad - M), (0, 0)))

    out = pl.pallas_call(
        functools.partial(_ln_linear_kernel, eps=eps),
        out_shape=jax.ShapeDtypeStruct((m_pad, n_pad), out_dtype),
        grid=(m_pad // tm,),
        in_specs=[
            pl.BlockSpec((tm, E), lambda i: (i, 0)),      # activations: tiled rows
            pl.BlockSpec((E, n_pad), lambda i: (0, 0)),   # weight (resident, bf16)
            pl.BlockSpec((1, n_pad), lambda i: (0, 0)),   # bias   (resident)
        ],
        out_specs=pl.BlockSpec((tm, n_pad), lambda i: (i, 0)),
        compiler_params=pltpu.CompilerParams(
            dimension_semantics=("parallel",),            # rows are independent
            vmem_limit_bytes=vmem_limit_bytes,
        ),
    )(x_in, w_pad, bias_pad)
    return out[:M] if need_pad else out


# ----------------------------------------------------------------------------
# SequenceToView forward
# ----------------------------------------------------------------------------
def sequence_to_view_fwd(params, x, *, patch_size, semantic_dim, channels):
    """x: (B, S, E) -> (B, channels, d*patch_size, d*patch_size)."""
    B, S, E = x.shape
    # Token slice commutes with the per-token projection -> slice first.
    xt = x[:, semantic_dim:, :]
    T = S - semantic_dim
    d = int(round(T ** 0.5))
    assert d * d == T, "number of kept tokens must be a perfect square"
    p, C = patch_size, channels
    N = p * p * C

    y = fused_layernorm_linear(xt.reshape(B * T, E),
                               params["w_pad"], params["b_pad"])   # (B*T, Npad)

    # Columns are (c, p1, p2)-ordered (reordered at init), so the innermost
    # output axis (w p2) reads contiguous runs; the [:N] slice of the padded
    # (all-zero) columns fuses into this reshape/transpose.
    # TODO(synk): for very large B*S, emit the rearranged layout straight from
    # the kernel via a custom out_spec index_map instead of this XLA transpose.
    y = y[:, :N].reshape(B, d, d, C, p, p)
    y = jnp.transpose(y, (0, 3, 1, 4, 2, 5))              # b c h p1 w p2
    return y.reshape(B, C, d * p, d * p)


# ----------------------------------------------------------------------------
# Parameters: torch-equivalent init + one-time kernel-layout preparation
# ----------------------------------------------------------------------------
def init_raw_params(key, embed_size, patch_size, channels):
    """Shapes match SequenceToView.__init__ (nn.LayerNorm + nn.Linear)."""
    n_out = patch_size * patch_size * channels
    k1, k2 = jax.random.split(key)
    return {
        "ln_g": jnp.ones((embed_size,), jnp.float32),
        "ln_b": jnp.zeros((embed_size,), jnp.float32),
        "w": 0.05 * jax.random.normal(k1, (embed_size, n_out), jnp.float32),
        "b": 0.01 * jax.random.normal(k2, (n_out,), jnp.float32),
    }


def prepare_params(raw, *, patch_size, channels):
    """ONE-TIME preprocessing (outside the jitted forward):
      1) fold LN affine into the linear,
      2) reorder columns (p1,p2,c) -> (c,p1,p2),
      3) pad N to a multiple of 128 (lane-dense stores) and cast weight to bf16.
    """
    E, n_out = raw["w"].shape
    p, C = patch_size, channels
    w_f = raw["ln_g"][:, None] * raw["w"]
    b_f = raw["ln_b"] @ raw["w"] + raw["b"]
    w_f = jnp.transpose(w_f.reshape(E, p, p, C), (0, 3, 1, 2)).reshape(E, n_out)
    b_f = jnp.transpose(b_f.reshape(p, p, C), (2, 0, 1)).reshape(n_out)
    n_pad = pl.cdiv(n_out, 128) * 128
    w_pad = jnp.zeros((E, n_pad), jnp.bfloat16).at[:, :n_out].set(
        w_f.astype(jnp.bfloat16))
    b_pad = jnp.zeros((1, n_pad), jnp.float32).at[:, :n_out].set(
        b_f.astype(jnp.float32))
    return {"w_pad": w_pad, "b_pad": b_pad}


# ----------------------------------------------------------------------------
# Pure-JAX reference (mirrors the torch module: project, slice, rearrange)
# ----------------------------------------------------------------------------
def reference_fwd(raw, x, *, patch_size, semantic_dim, channels, eps=1e-5):
    B, S, E = x.shape
    mu = jnp.mean(x, -1, keepdims=True)
    var = jnp.mean((x - mu) ** 2, -1, keepdims=True)
    xn = (x - mu) / jnp.sqrt(var + eps) * raw["ln_g"] + raw["ln_b"]
    y = xn @ raw["w"] + raw["b"]
    y = y[:, semantic_dim:, :]
    T = S - semantic_dim
    d, p, C = int(round(T ** 0.5)), patch_size, channels
    y = y.reshape(B, d, d, p, p, C)
    y = jnp.transpose(y, (0, 5, 1, 3, 2, 4))
    return y.reshape(B, C, d * p, d * p)


if __name__ == "__main__":
    VIEW_SIZE = 64        # = tokens_per_side * patch_size
    PATCH_SIZE = 4
    EMBED_SIZE = 256
    SEMANTIC_DIM = 1      # leading CLS / semantic token that is dropped
    CHANNELS = 3
    B = 2
    H_TOK = VIEW_SIZE // PATCH_SIZE                       # 16 tokens per side
    S = H_TOK * H_TOK + SEMANTIC_DIM                      # 257 tokens

    key = jax.random.PRNGKey(0)
    key, kx = jax.random.split(key)
    x = jax.random.normal(kx, (B, S, EMBED_SIZE), dtype=jnp.float32)

    raw = init_raw_params(key, EMBED_SIZE, PATCH_SIZE, CHANNELS)
    params = prepare_params(raw, patch_size=PATCH_SIZE, channels=CHANNELS)

    fwd = jax.jit(functools.partial(
        sequence_to_view_fwd,
        patch_size=PATCH_SIZE, semantic_dim=SEMANTIC_DIM, channels=CHANNELS))

    out = jax.block_until_ready(fwd(params, x))

    assert out.shape == (B, CHANNELS, VIEW_SIZE, VIEW_SIZE), out.shape
    assert bool(jnp.all(jnp.isfinite(out)))

    # Correctness vs. plain-JAX reference (bf16 MXU operands -> ~1e-2 tolerance).
    ref = reference_fwd(raw, x, patch_size=PATCH_SIZE,
                        semantic_dim=SEMANTIC_DIM, channels=CHANNELS)
    err = float(jnp.max(jnp.abs(out - ref)))
    assert err < 5e-2, f"max abs error vs reference = {err}"

    print("KERNEL_OK")
</pallas_src>

<mosaic_0001>
module attributes {stable_mosaic.version = 11 : i64} {
  func.func @_ln_linear_kernel(%arg0: i32, %arg1: memref<64x256xf32, #tpu.memory_space<vmem>>, %arg2: memref<256x128xbf16, #tpu.memory_space<vmem>>, %arg3: memref<1x128xf32, #tpu.memory_space<vmem>>, %arg4: memref<64x128xf32, #tpu.memory_space<vmem>>) attributes {dimension_semantics = [#tpu.dimension_semantics<parallel>], iteration_bounds = array<i64: 8>, scalar_prefetch = 0 : i64, scratch_operands = 0 : i64, tpu.core_type = #tpu.core_type<tc>, window_params = [{transform_indices = @transform_0, window_bounds = array<i64: 64, 256>}, {pipeline_mode = #tpu.pipeline_mode<synchronous>, transform_indices = @transform_1, window_bounds = array<i64: 256, 128>}, {pipeline_mode = #tpu.pipeline_mode<synchronous>, transform_indices = @transform_2, window_bounds = array<i64: 1, 128>}, {transform_indices = @transform_3, window_bounds = array<i64: 64, 128>}]} {
    %c0 = arith.constant 0 : index
    %c0_0 = arith.constant 0 : index
    %0 = vector.load %arg1[%c0, %c0_0] : memref<64x256xf32, #tpu.memory_space<vmem>>, vector<64x256xf32>
    %cst = arith.constant dense<0.000000e+00> : vector<64xf32>
    %1 = vector.multi_reduction <add>, %0, %cst [1] : vector<64x256xf32> to vector<64xf32>
    %2 = vector.shape_cast %1 : vector<64xf32> to vector<64x1xf32>
    %cst_1 = arith.constant 2.560000e+02 : f32
    %3 = vector.broadcast %cst_1 : f32 to vector<64x1xf32>
    %4 = arith.divf %2, %3 : vector<64x1xf32>
    %5 = arith.mulf %0, %0 : vector<64x256xf32>
    %cst_2 = arith.constant dense<0.000000e+00> : vector<64xf32>
    %6 = vector.multi_reduction <add>, %5, %cst_2 [1] : vector<64x256xf32> to vector<64xf32>
    %7 = vector.shape_cast %6 : vector<64xf32> to vector<64x1xf32>
    %cst_3 = arith.constant 2.560000e+02 : f32
    %8 = vector.broadcast %cst_3 : f32 to vector<64x1xf32>
    %9 = arith.divf %7, %8 : vector<64x1xf32>
    %10 = arith.mulf %4, %4 : vector<64x1xf32>
    %11 = arith.subf %9, %10 : vector<64x1xf32>
    %12 = vector.broadcast %4 : vector<64x1xf32> to vector<64x256xf32>
    %13 = arith.subf %0, %12 : vector<64x256xf32>
    %cst_4 = arith.constant 9.99999974E-6 : f32
    %14 = vector.broadcast %cst_4 : f32 to vector<64x1xf32>
    %15 = arith.addf %11, %14 : vector<64x1xf32>
    %16 = math.rsqrt %15 : vector<64x1xf32>
    %17 = vector.broadcast %16 : vector<64x1xf32> to vector<64x256xf32>
    %18 = arith.mulf %13, %17 : vector<64x256xf32>
    %19 = arith.truncf %18 : vector<64x256xf32> to vector<64x256xbf16>
    %c0_5 = arith.constant 0 : index
    %c0_6 = arith.constant 0 : index
    %20 = vector.load %arg2[%c0_5, %c0_6] : memref<256x128xbf16, #tpu.memory_space<vmem>>, vector<256x128xbf16>
    %cst_7 = arith.constant dense<0.000000e+00> : vector<64x128xf32>
    %21 = tpu.matmul %19, %20, %cst_7 {dimension_numbers = #tpu.dot_dimension_numbers<[1], [0], [0], [1], [0, 0, 1, 1], [], []>} : vector<64x256xbf16>, vector<256x128xbf16>, vector<64x128xf32> -> vector<64x128xf32>
    %c0_8 = arith.constant 0 : index
    %c0_9 = arith.constant 0 : index
    %22 = vector.load %arg3[%c0_8, %c0_9] : memref<1x128xf32, #tpu.memory_space<vmem>>, vector<1x128xf32>
    %23 = vector.broadcast %22 : vector<1x128xf32> to vector<64x128xf32>
    %24 = arith.addf %21, %23 : vector<64x128xf32>
    %c0_10 = arith.constant 0 : index
    %c0_11 = arith.constant 0 : index
    %25 = vector.load %arg4[%c0_10, %c0_11] : memref<64x128xf32, #tpu.memory_space<vmem>>, vector<64x128xf32>
    tpu.vector_store %arg4[%c0_10, %c0_11], %24 {strides = array<i32>} : memref<64x128xf32, #tpu.memory_space<vmem>>, vector<64x128xf32>,
    return
  }
  func.func @transform_0(%arg0: i32) -> (i32, i32) {
    %c0_i32 = arith.constant 0 : i32
    %c0_i32_0 = arith.constant 0 : i32
    return %arg0, %c0_i32 : i32, i32
  }
  func.func @transform_1(%arg0: i32) -> (i32, i32) {
    %c0_i32 = arith.constant 0 : i32
    %c0_i32_0 = arith.constant 0 : i32
    %c0_i32_1 = arith.constant 0 : i32
    return %c0_i32, %c0_i32_0 : i32, i32
  }
  func.func @transform_2(%arg0: i32) -> (i32, i32) {
    %c0_i32 = arith.constant 0 : i32
    %c0_i32_0 = arith.constant 0 : i32
    %c0_i32_1 = arith.constant 0 : i32
    return %c0_i32, %c0_i32_0 : i32, i32
  }
  func.func @transform_3(%arg0: i32) -> (i32, i32) {
    %c0_i32 = arith.constant 0 : i32
    %c0_i32_0 = arith.constant 0 : i32
    return %arg0, %c0_i32 : i32, i32
  }
}

</mosaic_0001>

<bundles_post_ra>
// kernel: sequence_to_view_fwd.1
= control target key start
LH: loop header
LB: loop body
LE: loop exit
PB: predicated region body
PF: predicated region fallthrough
CT: control target
= control target key end

     0   :  { %8 = vsyncpa [#allocation3], 0  ;;  %s1171_s0 = inlined_call_operand.vmem [shape: f32[512,256], index: 0, kind: input, shape index: {}]   ;;  %s1172_s1 = inlined_call_operand.hbm [shape: bf16[256,128], index: 1, kind: input, shape index: {}]   ;;  %s1173_s2 = inlined_call_operand.hbm [shape: f32[1,128], index: 2, kind: input, shape index: {}]   ;;  %s1174_s3 = inlined_call_operand.vmem [shape: f32[512,128], index: 3, kind: output, shape index: {}]  }
   0x1   :  { %9 = vsyncpa [#allocation5], 0  ;;  %s910_s12 = smov 0  }
   0x2 LB: > { %s661_s13 = sadd.s32 4294967295, %s884_s12   ;;  %p663_p0 = scmp.ge.s32.totalorder %s884_s12, 1  ;;  %s884_s12 = sphi %s910_s12, %s15_s12  }
   0x3   : > { %p114_p1 = scmp.lt.s32.totalorder %s884_s12, 9  ;;  %s886_s14 = smov [#allocation2]  }
   0x4   : > { %s126_s15 = sshll.u32 %s886_s14, 4  ;;  %p924_p3 = scmp.eq.s32.totalorder %s661_s13, 0  ;;  %s127_s15 = int_to_ptr.vmem [resolvable:$true] %s126_s15 }
   0x5   : > { %p918_p2 = pnand %p663_p0, %p114_p1  ;;  %s887_s18 = smov [#allocation4]  }
   0x6   : > { %s1179_s17 = scalar_select %p924_p3, 1, 0 }
   0x7   : > { %s1178_s16 = scalar_select %p918_p2, 1, 0 }
   0x8   : > { %p759_p4 = pneg %p918_p2  ;;  %s140_s19 = sshll.u32 %s887_s18, 4  ;;  %s936_s19 = int_to_ptr.vmem [resolvable:$true] %s140_s19 }
   0x9   : > { %s814_s23 = scalar_lea.hbm %s1172_s1, 2048 }
   0xa   : > { %p932_p5 = pnand %p924_p3, %p759_p4  ;;  %p815_p6 = scmp.ne.s32.totalorder %s1172_s1, %s814_s23 }
   0xb   : > { %p821_p10 = scmp.lt.u32.totalorder %s814_s23, %s1172_s1 }
   0xc   : > { %p816_p7 = pneg %p932_p5 }
   0xe   : > { %p817_p8 = pnand %p816_p7, %p815_p6 }
  0x10   : > { %p818_p9 = pneg %p817_p8 }
  0x12   : > { %p823_p11 = pnand %p821_p10, %p818_p9 }
  0x14   : > { %826 = shalt.err (!%p823_p11)
}
  0x15   : > { %s827_s28 = scalar_lea.vmem %s127_s15, 2048  ;;  %p835_p1 = scmp.lt.s32.totalorder %s127_s15, %s127_s15 }
  0x16   : > { %p828_p12 = scmp.ne.s32.totalorder %s127_s15, %s827_s28  ;;  %p836_p4 = scmp.lt.s32.totalorder %s827_s28, %s827_s28 }
  0x18   : > { %p830_p13 = pnand %p828_p12, %p816_p7  ;;  %p837_p3 = por %p836_p4, %p835_p1 }
  0x1a   : > { %p831_p0 = pneg %p830_p13 }
  0x1c   : > { %p838_p2 = pnand %p837_p3, %p831_p0 }
  0x1e   : > { %841 = shalt.err (!%p838_p2)
}
  0x1f   : > { %s888_s29 = smov 64   ;;  %s889_s30 = smov 4  }
  0x20   : > { %762 = dma.hbm_to_vmem [thread:$0]  (!%p932_p5), %s1172_s1, 2048, %s127_s15, [#allocation3], %s888_s29, %s888_s29, %s889_s30  }
  0x21   : > { %s842_s8 = scalar_lea.hbm %s1173_s2, 16 }
  0x22   : > { %p843_p6 = scmp.ne.s32.totalorder %s1173_s2, %s842_s8  ;;  %p849_p8 = scmp.lt.u32.totalorder %s842_s8, %s1173_s2 }
  0x24   : > { %p845_p2 = pnand %p843_p6, %p816_p7 }
  0x26   : > { %p846_p3 = pneg %p845_p2 }
  0x28   : > { %p851_p9 = pnand %p849_p8, %p846_p3 }
  0x2a   : > { %854 = shalt.err (!%p851_p9)
}
  0x2b   : > { %s855_s15 = scalar_lea.vmem %s936_s19, 16  ;;  %s862_s18 = scalar_lea.vmem %s936_s19, 32 }
  0x2c   : > { %p856_p10 = scmp.ne.s32.totalorder %s936_s19, %s855_s15  ;;  %p863_p13 = scmp.lt.s32.totalorder %s936_s19, %s936_s19 }
  0x2d   : > { %p864_p0 = scmp.lt.s32.totalorder %s862_s18, %s855_s15 }
  0x2e   : > { %p858_p11 = pnand %p856_p10, %p816_p7 }
  0x2f   : > { %p865_p1 = por %p864_p0, %p863_p13 }
  0x30   : > { %p859_p12 = pneg %p858_p11 }
  0x32   : > { %p866_p4 = pnand %p865_p1, %p859_p12 }
  0x34   : > { %869 = shalt.err (!%p866_p4)
}
  0x35   : > { %765 = dma.hbm_to_vmem [thread:$0]  (!%p932_p5), %s1173_s2, 16, %s936_s19, [#allocation5]  }
  0x36   : > { %p1181_p6 = scmp.ne.s32.totalorder %s1178_s16, 0 }
  0x37   : > { %p1182_p7 = scmp.ne.s32.totalorder (!%p1181_p6), %s1179_s17, 0 }
  0x38   : > { %163 = sbr.rel (%p1181_p6) target bundleno = 488 (0x1e8), region = 32 }
  0x3f   : > { %875 = dma.done.wait (%p1182_p7), [#allocation3], 2048  }
  0x40   : > { %877 = vsyncadd (%p1182_p7), [#allocation3], 4294965248 }
  0x41   : > { %879 = dma.done.wait (%p1182_p7), [#allocation5], 16  }
  0x42   : > { %881 = vsyncadd (%p1182_p7), [#allocation5], 4294967280  ;;  %s670_s20 = sshll.u32 %s661_s13, 3  ;;  %v782_v16 = vld [vmem:[#allocation2 + $0x40] sm:$0xff]   ;;  %v784_v36 = vld [vmem:[#allocation2 + $0x48] sm:$0xff]  }
  0x43   : > { %p193_p2 = scmp.lt.s32.totalorder %s670_s20, 63  ;;  %v783_v20 = vld [vmem:[#allocation2] sm:$0xff]   ;;  %695 = vmatprep.subr.bf16.mxu0 %v782_v16  ;;  %735 = vmatprep.subr.bf16.mxu1 %v782_v16  ;;  %v785_v40 = vld [vmem:[#allocation2 + $0x8] sm:$0xff]   ;;  %v786_v44 = vld [vmem:[#allocation2 + $0x50] sm:$0xff]  }
  0x44   : > { %696 = vmatpush3.bf16.msra.mxu0 %v783_v20  ;;  %743 = vmatpush3.bf16.msra.mxu1 %v783_v20  ;;  %v787_v48 = vld [vmem:[#allocation2 + $0x10] sm:$0xff]   ;;  %v788_v52 = vld [vmem:[#allocation2 + $0x58] sm:$0xff]   ;;  %v790_v56 = vld [vmem:[#allocation2 + $0x60] sm:$0xff]  }
  0x45   : > { %s1184_s20 = smov (!%p193_p2, %s670_s20), 63  ;;  %697 = vmatprep.subr.bf16.mxu0 %v784_v36  ;;  %736 = vmatprep.subr.bf16.mxu1 %v784_v36  ;;  %v789_v54 = vld [vmem:[#allocation2 + $0x18] sm:$0xff]   ;;  %v791_v57 = vld [vmem:[#allocation2 + $0x20] sm:$0xff]   ;;  %v792_v58 = vld [vmem:[#allocation2 + $0x68] sm:$0xff]  }
  0x46   : > { %s694_s16 = sshll.u32 %s1184_s20, 4  ;;  %v793_v59 = vld [vmem:[#allocation2 + $0x28] sm:$0xff]   ;;  %v794_v60 = vld [vmem:[#allocation2 + $0x70] sm:$0xff]   ;;  %v796_v62 = vld [vmem:[#allocation2 + $0x78] sm:$0xff]   ;;  %s674_s13 = sshll.u32 %s1184_s20, 3 }
  0x47   : > { %s1004_s24 = scalar_lea.vmem %s1171_s0, %s694_s16  ;;  %v795_v61 = vld [vmem:[#allocation2 + $0x30] sm:$0xff]   ;;  %v797_v63 = vld [vmem:[#allocation2 + $0x38] sm:$0xff]   ;;  %s1158_s26 = scalar_lea.vmem %s1174_s3, %s674_s13 }
  0x48   : > { %v1007_v0 = vld [vmem:[%s1004_s24 + $0x40] sm:$0xff]  ;;  %v1010_v1 = vld [vmem:[%s1004_s24 + $0x48] sm:$0xff]  ;;  %v1021_v5 = vld [vmem:[%s1004_s24 + $0x50] sm:$0xff]  ;;  %698 = vmatpush3.bf16.msra.mxu0 %v785_v40  ;;  %744 = vmatpush3.bf16.msra.mxu1 %v785_v40 }
  0x49   : > { %v1013_v2 = vld [vmem:[%s1004_s24] sm:$0xff]  ;;  %v234_v3 = vadd.f32 %v1010_v1, %v1007_v0  ;;  %v1018_v4 = vld [vmem:[%s1004_s24 + $0x8] sm:$0xff]  ;;  %v1024_v6 = vld [vmem:[%s1004_s24 + $0x58] sm:$0xff]  ;;  %v265_v18 = vmul.f32 %v1021_v5, %v1021_v5  ;;  %v263_v22 = vmul.f32 %v1007_v0, %v1007_v0  ;;  %v264_v23 = vmul.f32 %v1010_v1, %v1010_v1  ;;  %699 = vmatprep.subr.bf16.mxu0 %v786_v44 }
  0x4a   : > { %v222_v7 = vadd.f32 %v1018_v4, %v1013_v2  ;;  %v1029_v8 = vld [vmem:[%s1004_s24 + $0x10] sm:$0xff]  ;;  %v1032_v9 = vld [vmem:[%s1004_s24 + $0x18] sm:$0xff]  ;;  %v237_v10 = vadd.f32 %v1024_v6, %v1021_v5  ;;  %v255_v14 = vmul.f32 %v1013_v2, %v1013_v2  ;;  %v256_v15 = vmul.f32 %v1018_v4, %v1018_v4  ;;  %v1061_v27 = vld [vmem:[%s1004_s24 + $0x20] sm:$0xff]  ;;  %737 = vmatprep.subr.bf16.mxu1 %v786_v44 }
  0x4b   : > { %235 = vadd.xlane.f32.xlu1 %v234_v3  ;;  %v257_v11 = vmul.f32 %v1029_v8, %v1029_v8  ;;  %v258_v12 = vmul.f32 %v1032_v9, %v1032_v9  ;;  %v225_v13 = vadd.f32 %v1032_v9, %v1029_v8  ;;  %v266_v19 = vmul.f32 %v1024_v6, %v1024_v6  ;;  %v1055_v24 = vld [vmem:[%s1004_s24 + $0x30] sm:$0xff]  ;;  %v1058_v25 = vld [vmem:[%s1004_s24 + $0x38] sm:$0xff]  ;;  %v1064_v28 = vld [vmem:[%s1004_s24 + $0x28] sm:$0xff] }
  0x4c   : > { %223 = vadd.xlane.f32.xlu0 %v222_v7  ;;  %v271_v21 = vadd.f32 %v256_v15, %v255_v14  ;;  %v283_v29 = vadd.f32 %v264_v23, %v263_v22  ;;  %v1067_v30 = vld [vmem:[%s1004_s24 + $0x70] sm:$0xff]  ;;  %v231_v31 = vadd.f32 %v1058_v25, %v1055_v24  ;;  %v228_v32 = vadd.f32 %v1064_v28, %v1061_v27  ;;  %v1074_v33 = vld [vmem:[%s1004_s24 + $0x78] sm:$0xff]  ;;  %v1077_v34 = vld [vmem:[%s1004_s24 + $0x60] sm:$0xff] }
  0x4d   : > { %v274_v17 = vadd.f32 %v258_v12, %v257_v11  ;;  %v286_v26 = vadd.f32 %v266_v19, %v265_v18  ;;  %v1080_v35 = vld [vmem:[%s1004_s24 + $0x68] sm:$0xff]  ;;  %v243_v37 = vadd.f32 %v1074_v33, %v1067_v30  ;;  %v261_v38 = vmul.f32 %v1055_v24, %v1055_v24  ;;  %700 = vmatpush3.bf16.msra.mxu0 %v787_v48 }
  0x4e   : > { %v262_v39 = vmul.f32 %v1058_v25, %v1058_v25  ;;  %v240_v41 = vadd.f32 %v1080_v35, %v1077_v34  ;;  %v259_v42 = vmul.f32 %v1061_v27, %v1061_v27  ;;  %v260_v43 = vmul.f32 %v1064_v28, %v1064_v28  ;;  %745 = vmatpush3.bf16.msra.mxu1 %v787_v48 }
  0x4f   : > { %238 = vadd.xlane.f32.xlu1 %v237_v10  ;;  %v269_v46 = vmul.f32 %v1067_v30, %v1067_v30  ;;  %v270_v47 = vmul.f32 %v1074_v33, %v1074_v33  ;;  %v267_v50 = vmul.f32 %v1077_v34, %v1077_v34  ;;  %v268_v51 = vmul.f32 %v1080_v35, %v1080_v35 }
  0x50   : > { %226 = vadd.xlane.f32.xlu0 %v225_v13  ;;  %v280_v45 = vadd.f32 %v262_v39, %v261_v38  ;;  %v277_v49 = vadd.f32 %v260_v43, %v259_v42  ;;  %701 = vmatprep.subr.bf16.mxu0 %v788_v52 }
  0x51   : > { %v292_v53 = vadd.f32 %v270_v47, %v269_v46  ;;  %v289_v55 = vadd.f32 %v268_v51, %v267_v50  ;;  %702 = vmatpush3.bf16.msra.mxu0 %v789_v54  ;;  %738 = vmatprep.subr.bf16.mxu1 %v788_v52 }
  0x52   : > { %746 = vmatpush3.bf16.msra.mxu1 %v789_v54  ;;  %703 = vmatprep.subr.bf16.mxu0 %v790_v56 }
  0x53   : > { %275 = vadd.xlane.f32.xlu1 %v274_v17  ;;  %739 = vmatprep.subr.bf16.mxu1 %v790_v56 }
  0x54   : > { %272 = vadd.xlane.f32.xlu0 %v271_v21 }
  0x55   : > { %704 = vmatpush3.bf16.msra.mxu0 %v791_v57 }
  0x56   : > { %747 = vmatpush3.bf16.msra.mxu1 %v791_v57  ;;  %705 = vmatprep.subr.bf16.mxu0 %v792_v58 }
  0x57   : > { %287 = vadd.xlane.f32.xlu1 %v286_v26  ;;  %740 = vmatprep.subr.bf16.mxu1 %v792_v58 }
  0x58   : > { %284 = vadd.xlane.f32.xlu0 %v283_v29 }
  0x59   : > { %706 = vmatpush3.bf16.msra.mxu0 %v793_v59 }
  0x5a   : > { %748 = vmatpush3.bf16.msra.mxu1 %v793_v59  ;;  %707 = vmatprep.subr.bf16.mxu0 %v794_v60 }
  0x5b   : > { %232 = vadd.xlane.f32.xlu1 %v231_v31  ;;  %741 = vmatprep.subr.bf16.mxu1 %v794_v60 }
  0x5c   : > { %229 = vadd.xlane.f32.xlu0 %v228_v32 }
  0x5d   : > { %708 = vmatpush3.bf16.msra.mxu0 %v795_v61 }
  0x5e   : > { %749 = vmatpush3.bf16.msra.mxu1 %v795_v61  ;;  %709 = vmatprep.subr.bf16.mxu0 %v796_v62 }
  0x5f   : > { %244 = vadd.xlane.f32.xlu1 %v243_v37  ;;  %742 = vmatprep.subr.bf16.mxu1 %v796_v62 }
  0x60   : > { %241 = vadd.xlane.f32.xlu0 %v240_v41 }
  0x61   : > { %710 = vmatpush3.bf16.msra.mxu0 %v797_v63 }
  0x62   : > { %750 = vmatpush3.bf16.msra.mxu1 %v797_v63 }
  0x63   : > { %281 = vadd.xlane.f32.xlu1 %v280_v45 }
  0x64   : > { %278 = vadd.xlane.f32.xlu0 %v277_v49 }
  0x67   : > { %293 = vadd.xlane.f32.xlu1 %v292_v53 }
  0x68   : > { %290 = vadd.xlane.f32.xlu0 %v289_v55 }
  0xd8   : > { %v236_v3 = vpop.xlane.xlu1 %235 }
  0xd9   : > { %v224_v7 = vpop.xlane.xlu0 %223  ;;  %v1104_v19 = vmul.f32 0.00390625, %v236_v3 }
  0xda   : > { %v247_v12 = vmul.f32 0.00390625, %v224_v7 }
  0xdb   : > { %v307_v38 = vmul.f32 %v1104_v19, %v1104_v19  ;;  %v327_v50 = vsub.f32 %v1007_v0, %v1104_v19  ;;  %v328_v51 = vsub.f32 %v1010_v1, %v1104_v19 }
  0xdc   : > { %v239_v10 = vpop.xlane.xlu1 %238  ;;  %v303_v20 = vmul.f32 %v247_v12, %v247_v12  ;;  %v319_v58 = vsub.f32 %v1013_v2, %v247_v12  ;;  %v320_v61 = vsub.f32 %v1018_v4, %v247_v12 }
  0xdd   : > { %v227_v11 = vpop.xlane.xlu0 %226  ;;  %v1102_v15 = vmul.f32 0.00390625, %v239_v10 }
  0xde   : > { %v248_v13 = vmul.f32 0.00390625, %v227_v11 }
  0xdf   : > { %v308_v31 = vmul.f32 %v1102_v15, %v1102_v15  ;;  %v330_v12 = vsub.f32 %v1024_v6, %v1102_v15 }
  0xe0   : > { %v276_v14 = vpop.xlane.xlu1 %275  ;;  %v304_v17 = vmul.f32 %v248_v13, %v248_v13  ;;  %v321_v52 = vsub.f32 %v1029_v8, %v248_v13  ;;  %v322_v56 = vsub.f32 %v1032_v9, %v248_v13  ;;  %v329_v9 = vsub.f32 %v1021_v5, %v1102_v15 }
  0xe1   : > { %v296_v16 = vmul.f32 0.00390625, %v276_v14  ;;  %v273_v18 = vpop.xlane.xlu0 %272 }
  0xe2   : > { %v295_v21 = vmul.f32 0.00390625, %v273_v18 }
  0xe3   : > { %v312_v22 = vsub.f32 %v296_v16, %v304_v17 }
  0xe4   : > { %v311_v23 = vsub.f32 %v295_v21, %v303_v20  ;;  %v288_v26 = vpop.xlane.xlu1 %287 }
  0xe5   : > { %v336_v29 = vadd.f32 1e-05, %v312_v22  ;;  %v300_v32 = vmul.f32 0.00390625, %v288_v26  ;;  %v285_v36 = vpop.xlane.xlu0 %284 }
  0xe6   : > { %v335_v37 = vadd.f32 1e-05, %v311_v23  ;;  %v299_v39 = vmul.f32 0.00390625, %v285_v36 }
  0xe7   : > { %798 = vrsqrt.f32 %v336_v29  ;;  %v316_v40 = vsub.f32 %v300_v32, %v308_v31 }
  0xe8   : > { %800 = vrsqrt.f32 %v335_v37  ;;  %v315_v41 = vsub.f32 %v299_v39, %v307_v38  ;;  %v233_v42 = vpop.xlane.xlu1 %232 }
  0xe9   : > { %v340_v43 = vadd.f32 1e-05, %v316_v40  ;;  %v230_v44 = vpop.xlane.xlu0 %229  ;;  %v1110_v47 = vmul.f32 0.00390625, %v233_v42 }
  0xea   : > { %v339_v45 = vadd.f32 1e-05, %v315_v41  ;;  %v1112_v49 = vmul.f32 0.00390625, %v230_v44 }
  0xeb   : > { %802 = vrsqrt.f32 %v340_v43  ;;  %v306_v59 = vmul.f32 %v1110_v47, %v1110_v47  ;;  %v325_v40 = vsub.f32 %v1055_v24, %v1110_v47  ;;  %v326_v41 = vsub.f32 %v1058_v25, %v1110_v47 }
  0xec   : > { %804 = vrsqrt.f32 %v339_v45  ;;  %v245_v46 = vpop.xlane.xlu1 %244  ;;  %v305_v8 = vmul.f32 %v1112_v49, %v1112_v49  ;;  %v323_v43 = vsub.f32 %v1061_v27, %v1112_v49  ;;  %v324_v44 = vsub.f32 %v1064_v28, %v1112_v49 }
  0xed   : > { %v242_v48 = vpop.xlane.xlu0 %241  ;;  %v1119_v53 = vmul.f32 0.00390625, %v245_v46 }
  0xee   : > { %v1121_v54 = vmul.f32 0.00390625, %v242_v48 }
  0xef   : > { %v310_v13 = vmul.f32 %v1119_v53, %v1119_v53  ;;  %v334_v24 = vsub.f32 %v1074_v33, %v1119_v53 }
  0xf0   : > { %v282_v55 = vpop.xlane.xlu1 %281  ;;  %v309_v4 = vmul.f32 %v1121_v54, %v1121_v54  ;;  %v331_v25 = vsub.f32 %v1077_v34, %v1121_v54  ;;  %v332_v27 = vsub.f32 %v1080_v35, %v1121_v54  ;;  %v675_v34 = vld [vmem:[#allocation4] ss:$0 sm:$0xff] }
  0xf1   : > { %v799_v57 = vpop.eup %798  ;;  %v298_v60 = vmul.f32 0.00390625, %v282_v55  ;;  %v279_v0 = vpop.xlane.xlu0 %278 }
  0xf2   : > { %v801_v1 = vpop.eup %800  ;;  %v297_v62 = vmul.f32 0.00390625, %v279_v0  ;;  %v354_v63 = vmul.f32 %v799_v57, %v322_v56  ;;  %v353_v3 = vmul.f32 %v799_v57, %v321_v52  ;;  %v333_v52 = vsub.f32 %v1067_v30, %v1119_v53 }
  0xf3   : > { %v314_v7 = vsub.f32 %v298_v60, %v306_v59  ;;  %v352_v10 = vmul.f32 %v801_v1, %v320_v61  ;;  %v351_v2 = vmul.f32 %v801_v1, %v319_v58 }
  0xf4   : > { %v313_v11 = vsub.f32 %v297_v62, %v305_v8  ;;  %v294_v14 = vpop.xlane.xlu1 %293 }
  0xf5   : > { %v803_v16 = vpop.eup %802  ;;  %v338_v17 = vadd.f32 1e-05, %v314_v7  ;;  %v302_v18 = vmul.f32 0.00390625, %v294_v14  ;;  %v291_v19 = vpop.xlane.xlu0 %290  ;;  %v368_v20 = vpack.c.bf16 %v354_v63, %v352_v10  ;;  %v367_v5 = vpack.c.bf16 %v353_v3, %v351_v2 }
  0xf6   : > { %v805_v21 = vpop.eup %804  ;;  %v337_v22 = vadd.f32 1e-05, %v313_v11  ;;  %v301_v23 = vmul.f32 0.00390625, %v291_v19  ;;  %v362_v26 = vmul.f32 %v803_v16, %v330_v12  ;;  %v361_v29 = vmul.f32 %v803_v16, %v329_v9 }
  0xf7   : > { %806 = vrsqrt.f32 %v338_v17  ;;  %v318_v31 = vsub.f32 %v302_v18, %v310_v13  ;;  %542 = vmatprep.mubr.bf16.mxu0 %v368_v20  ;;  %v360_v32 = vmul.f32 %v805_v21, %v328_v51  ;;  %v359_v36 = vmul.f32 %v805_v21, %v327_v50 }
  0xf8   : > { %808 = vrsqrt.f32 %v337_v22  ;;  %v317_v37 = vsub.f32 %v301_v23, %v309_v4  ;;  %543 = vmatmul.mubr.bf16.vlgmr.msra.gmra.mrb[0].mxu0 %v367_v5 }
  0xf9   : > { %v342_v6 = vadd.f32 1e-05, %v318_v31  ;;  %v372_v15 = vpack.c.bf16 %v362_v26, %v360_v32  ;;  %v371_v38 = vpack.c.bf16 %v361_v29, %v359_v36 }
  0xfa   : > { %v341_v39 = vadd.f32 1e-05, %v317_v37 }
  0xfb   : > { %810 = vrsqrt.f32 %v342_v6  ;;  %558 = vmatprep.mubr.bf16.mxu1 %v372_v15 }
  0xfc   : > { %812 = vrsqrt.f32 %v341_v39  ;;  %559 = vmatmul.mubr.bf16.vlgmr.msra.gmra.mrb[0].mxu1 %v371_v38 }
 0x101   : > { %v807_v42 = vpop.eup %806 }
 0x102   : > { %v809_v45 = vpop.eup %808  ;;  %v358_v46 = vmul.f32 %v807_v42, %v326_v41  ;;  %v357_v48 = vmul.f32 %v807_v42, %v325_v40 }
 0x103   : > { %v356_v50 = vmul.f32 %v809_v45, %v324_v44  ;;  %v355_v51 = vmul.f32 %v809_v45, %v323_v43 }
 0x105   : > { %v811_v55 = vpop.eup %810  ;;  %v370_v28 = vpack.c.bf16 %v358_v46, %v356_v50  ;;  %v369_v47 = vpack.c.bf16 %v357_v48, %v355_v51 }
 0x106   : > { %v813_v49 = vpop.eup %812  ;;  %v366_v56 = vmul.f32 %v811_v55, %v334_v24  ;;  %v365_v57 = vmul.f32 %v811_v55, %v333_v52 }
 0x107   : > { %550 = vmatprep.mubr.bf16.mxu0 %v370_v28  ;;  %v364_v58 = vmul.f32 %v813_v49, %v332_v27  ;;  %v363_v59 = vmul.f32 %v813_v49, %v331_v25 }
 0x108   : > { %551 = vmatmul.mubr.bf16.gmra.mrb[4].mxu0 %v369_v47 }
 0x109   : > { %v374_v30 = vpack.c.bf16 %v366_v56, %v364_v58  ;;  %v373_v60 = vpack.c.bf16 %v365_v57, %v363_v59 }
 0x10b   : > { %566 = vmatprep.mubr.bf16.mxu1 %v374_v30 }
 0x10c   : > { %567 = vmatmul.mubr.bf16.gmra.mrb[4].mxu1 %v373_v60 }
 0x1cb   : > { %v711_v33 = vpop.f32.mrb[0].mxu0 }
 0x1cc   : > { %v712_v53 = vpop.f32.mrb[1].mxu0 }
 0x1cd   : > { %v713_v0 = vadd.f32 %v712_v53, %v711_v33  ;;  %v714_v61 = vpop.f32.mrb[2].mxu0 }
 0x1ce   : > { %v715_v35 = vpop.f32.mrb[3].mxu0 }
 0x1cf   : > { %v545_v54 = vadd.f32 %v713_v0, %v675_v34  ;;  %v716_v1 = vadd.f32 %v715_v35, %v714_v61  ;;  %v723_v8 = vpop.f32.mrb[0].mxu1 }
 0x1d0   : > { %v724_v62 = vpop.f32.mrb[1].mxu1 }
 0x1d1   : > { %575 = vst [vmem:[%s1158_s26] sm:$0xff] %v545_v54  ;;  %v548_v63 = vadd.f32 %v716_v1, %v675_v34  ;;  %v725_v3 = vadd.f32 %v724_v62, %v723_v8  ;;  %v726_v9 = vpop.f32.mrb[2].mxu1 }
 0x1d2   : > { %v727_v7 = vpop.f32.mrb[3].mxu1 }
 0x1d3   : > { %576 = vst [vmem:[%s1158_s26 + $0x8] sm:$0xff] %v548_v63  ;;  %v561_v10 = vadd.f32 %v725_v3, %v675_v34  ;;  %v728_v2 = vadd.f32 %v727_v7, %v726_v9 }
 0x1d5   : > { %579 = vst [vmem:[%s1158_s26 + $0x20] sm:$0xff] %v561_v10  ;;  %v564_v11 = vadd.f32 %v728_v2, %v675_v34 }
 0x1d7   : > { %580 = vst [vmem:[%s1158_s26 + $0x28] sm:$0xff] %v564_v11 }
 0x1db   : > { %v717_v13 = vpop.f32.mrb[4].mxu0 }
 0x1dc   : > { %v718_v14 = vpop.f32.mrb[5].mxu0 }
 0x1dd   : > { %v719_v4 = vadd.f32 %v718_v14, %v717_v13  ;;  %v720_v12 = vpop.f32.mrb[6].mxu0 }
 0x1de   : > { %v721_v16 = vpop.f32.mrb[7].mxu0 }
 0x1df   : > { %v553_v17 = vadd.f32 %v719_v4, %v675_v34  ;;  %v722_v18 = vadd.f32 %v721_v16, %v720_v12  ;;  %v729_v19 = vpop.f32.mrb[4].mxu1 }
 0x1e0   : > { %v730_v20 = vpop.f32.mrb[5].mxu1 }
 0x1e1   : > { %577 = vst [vmem:[%s1158_s26 + $0x10] sm:$0xff] %v553_v17  ;;  %v556_v5 = vadd.f32 %v722_v18, %v675_v34  ;;  %v731_v21 = vadd.f32 %v730_v20, %v729_v19  ;;  %v732_v22 = vpop.f32.mrb[6].mxu1 }
 0x1e2   : > { %v733_v23 = vpop.f32.mrb[7].mxu1 }
 0x1e3   : > { %578 = vst [vmem:[%s1158_s26 + $0x18] sm:$0xff] %v556_v5  ;;  %v569_v26 = vadd.f32 %v731_v21, %v675_v34  ;;  %v734_v29 = vadd.f32 %v733_v23, %v732_v22 }
 0x1e5   : > { %581 = vst [vmem:[%s1158_s26 + $0x30] sm:$0xff] %v569_v26  ;;  %v572_v31 = vadd.f32 %v734_v29, %v675_v34 }
 0x1e7   : > { %582 = vst [vmem:[%s1158_s26 + $0x38] sm:$0xff] %v572_v31 }
 0x1e8 PF: > { %s15_s12 = sadd.s32 1, %s884_s12  }
 0x1e9   : > { %p12_p5 = scmp.ge.s32.totalorder %s15_s12, 10  }
 0x1eb   :  { %14 = sbr.rel (!%p12_p5) target bundleno = 2 (0x2), region = 71 }
 0x1f2   :  { %605 = vsyncpa [#allocation3], 1 }
 0x1f3   :  { %607 = vsyncpa [#allocation3 + $0x1], 1 }
 0x1f4   :  { %608 = vsyncpa [#allocation5], 1 }

</bundles_post_ra>
